<compile_context>
chip_gen: v5e
topology: v5e:2x2
jax: 0.10.0
libtpu: 0.0.40
codegen_flags: <defaults>
</compile_context>

<pallas_src>
import jax
import jax.numpy as jnp
from jax.experimental import pallas as pl
from jax.experimental.pallas import tpu as pltpu


def _round_up(x, m):
    return (x + m - 1) // m * m


def _device_kind():
    try:
        return jax.devices()[0].device_kind.lower()
    except Exception:
        return ""


def _leaky_relu(h, slope=0.2):
    return jnp.where(h >= 0, h, slope * h)


def _bow_branch(avg_embed, w_h, b_h, w_head, b_head):
    h = _leaky_relu(
        jnp.dot(avg_embed, w_h, preferred_element_type=jnp.float32) + b_h)
    return jnp.dot(h, w_head, preferred_element_type=jnp.float32) + b_head


def _beo_branch(x, w_h, b_h, w_head, b_head):
    # Normalization is pre-folded into w_h / b_h by the wrapper.
    h = _leaky_relu(
        jnp.dot(x, w_h, preferred_element_type=jnp.float32) + b_h)
    return jnp.dot(h, w_head, preferred_element_type=jnp.float32) + b_head


# ----------------------------- kernels ------------------------------------- #

def embed_model_kernel_resident(
    counts_ref,                # (TB, Vp)   counts / S  (bf16 or f32)
    x_ref,                     # (TB, BEOp) continuous features (padded)
    embed_ref,                 # (Vp, Ep)   full embedding table (VMEM-resident)
    w_bh_ref, b_bh_ref,        # (Ep, 256), (1, 256)
    w_bhead_ref, b_bhead_ref,  # (256, 128), (1, 128)   [bow_pred | bow_embd | 0]
    w_eh_ref, b_eh_ref,        # (BEOp, 256), (1, 256)  (normalization folded in)
    w_ehead_ref, b_ehead_ref,  # (256, 128), (1, 128)   [beo_pred | beo_embd | 0]
    bow_out_ref,               # (TB, 128)
    beo_out_ref,               # (TB, 128)
):
    avg_embed = jnp.dot(counts_ref[...].astype(jnp.float32), embed_ref[...],
                        preferred_element_type=jnp.float32)
    bow_out_ref[...] = _bow_branch(avg_embed, w_bh_ref[...], b_bh_ref[...],
                                   w_bhead_ref[...], b_bhead_ref[...])
    beo_out_ref[...] = _beo_branch(x_ref[...], w_eh_ref[...], b_eh_ref[...],
                                   w_ehead_ref[...], b_ehead_ref[...])


def embed_model_kernel_streaming(
    counts_ref,                # (TB, TV)
    x_ref,                     # (TB, BEOp)
    embed_ref,                 # (TV, Ep)  vocab tile
    w_bh_ref, b_bh_ref,
    w_bhead_ref, b_bhead_ref,
    w_eh_ref, b_eh_ref,
    w_ehead_ref, b_ehead_ref,
    bow_out_ref, beo_out_ref,
    acc_ref,                   # (TB, Ep) f32 running sum over vocab tiles
):
    k = pl.program_id(1)
    nk = pl.num_programs(1)

    @pl.when(k == 0)
    def _():
        acc_ref[...] = jnp.zeros_like(acc_ref)
        # beo branch is independent of the vocab loop: run it at k==0 so its
        # matmuls overlap the later embed-tile DMAs instead of the epilogue.
        beo_out_ref[...] = _beo_branch(x_ref[...], w_eh_ref[...], b_eh_ref[...],
                                       w_ehead_ref[...], b_ehead_ref[...])

    acc_ref[...] += jnp.dot(counts_ref[...].astype(jnp.float32), embed_ref[...],
                            preferred_element_type=jnp.float32)

    @pl.when(k == nk - 1)
    def _():
        bow_out_ref[...] = _bow_branch(acc_ref[...], w_bh_ref[...], b_bh_ref[...],
                                       w_bhead_ref[...], b_bhead_ref[...])


# ----------------------------- wrapper -------------------------------------- #

def embed_model_forward(sentence, x, params, mean, std):
    """sentence: (B, S) int32 token ids; x: (B, beo) float32."""
    B, S = sentence.shape
    beo = x.shape[1]
    V, E = params["embed"].shape
    H = params["w_bow_h"].shape[1]          # 256
    P = params["w_bow_p"].shape[1]          # 6
    EM = params["w_bow_e"].shape[1]         # 64
    HEAD = _round_up(P + EM, 128)           # lane-dense fused head width (128)

    f32 = jnp.float32
    kind = _device_kind()

    # Per-generation tile / VMEM policy.
    if "v5" in kind:                        # v5e: 128x128 MXU, ~0.8 TB/s HBM
        tb_cap, resident_budget, vmem_limit = 128, 80 << 20, 64 << 20
    elif "v7" in kind:                      # v7x: 64 MiB VMEM/TC, 2 TCs
        tb_cap, resident_budget, vmem_limit = 256, 40 << 20, 48 << 20
    else:                                   # v6e / default
        tb_cap, resident_budget, vmem_limit = 256, 80 << 20, 96 << 20

    # Batch tile: multiple of 16 (safe sublane count for bf16 counts too).
    TB = min(tb_cap, _round_up(B, 16))
    if "v7" in kind:
        # Keep >=2 grid points on the parallel batch axis for the 2 TensorCores
        # whenever B is large enough to split.
        TB = min(TB, max(16, _round_up((B + 1) // 2, 16)))
    Bp = _round_up(B, TB)
    nb = Bp // TB

    Ep = _round_up(E, 128)
    BEOp = _round_up(beo, 128)

    resident = _round_up(V, 128) * Ep * 4 <= resident_budget
    if resident:
        Vp = _round_up(V, 128)
    else:
        TV = min(2048, _round_up(V, 128))   # long DMAs, few grid steps
        Vp = _round_up(V, TV)

    # counts in bf16 when exact (S a power of two): halves the widest DMA stream.
    pow2_S = S > 0 and (S & (S - 1)) == 0
    counts_dtype = jnp.bfloat16 if (pow2_S and S <= 256) else f32

    # --- glue: bag-of-words counts scaled by 1/S so counts @ embed == mean ---
    counts = jnp.zeros((Bp, Vp), f32)
    counts = counts.at[jnp.arange(B)[:, None], sentence].add(1.0 / S)
    counts = counts.astype(counts_dtype)

    x_p = jnp.zeros((Bp, BEOp), f32).at[:B, :beo].set(x)
    embed_p = jnp.zeros((Vp, Ep), f32).at[:V, :E].set(params["embed"])

    w_bh = jnp.zeros((Ep, H), f32).at[:E].set(params["w_bow_h"])
    b_bh = params["b_bow_h"].reshape(1, H)

    # Fold (x - mean)/std into the beo hidden layer (one-time weight transform).
    inv_std = 1.0 / std
    w_eh_f = params["w_beo_h"] * inv_std
    b_eh_f = (params["b_beo_h"].reshape(1, H)
              - (mean * inv_std) * params["w_beo_h"].sum(axis=0, keepdims=True))
    w_eh = jnp.zeros((BEOp, H), f32).at[:beo].set(w_eh_f)
    b_eh = b_eh_f

    def head_slab(w_p, b_p, w_e, b_e):
        w = jnp.zeros((H, HEAD), f32).at[:, :P].set(w_p).at[:, P:P + EM].set(w_e)
        b = (jnp.zeros((1, HEAD), f32)
             .at[:, :P].set(b_p.reshape(1, P))
             .at[:, P:P + EM].set(b_e.reshape(1, EM)))
        return w, b

    w_bhead, b_bhead = head_slab(params["w_bow_p"], params["b_bow_p"],
                                 params["w_bow_e"], params["b_bow_e"])
    w_ehead, b_ehead = head_slab(params["w_beo_p"], params["b_beo_p"],
                                 params["w_beo_e"], params["b_beo_e"])

    out_shape = (
        jax.ShapeDtypeStruct((Bp, HEAD), f32),
        jax.ShapeDtypeStruct((Bp, HEAD), f32),
    )

    if resident:
        def full(shape):
            return pl.BlockSpec(shape, lambda i: (0,) * len(shape))

        in_specs = [
            pl.BlockSpec((TB, Vp), lambda i: (i, 0)),      # counts
            pl.BlockSpec((TB, BEOp), lambda i: (i, 0)),    # x
            pl.BlockSpec((Vp, Ep), lambda i: (0, 0)),      # embed (resident)
            full((Ep, H)), full((1, H)),                   # bow hidden
            full((H, HEAD)), full((1, HEAD)),              # bow fused head
            full((BEOp, H)), full((1, H)),                 # beo hidden
            full((H, HEAD)), full((1, HEAD)),              # beo fused head
        ]
        out_specs = (
            pl.BlockSpec((TB, HEAD), lambda i: (i, 0)),
            pl.BlockSpec((TB, HEAD), lambda i: (i, 0)),
        )
        grid = (nb,)
        scratch_shapes = []
        kernel = embed_model_kernel_resident
        dim_sem = ("parallel",)
    else:
        nv = Vp // TV

        def full(shape):
            return pl.BlockSpec(shape, lambda i, k: (0, 0))

        in_specs = [
            pl.BlockSpec((TB, TV), lambda i, k: (i, k)),   # counts
            pl.BlockSpec((TB, BEOp), lambda i, k: (i, 0)), # x
            pl.BlockSpec((TV, Ep), lambda i, k: (k, 0)),   # embed tile
            full((Ep, H)), full((1, H)),
            full((H, HEAD)), full((1, HEAD)),
            full((BEOp, H)), full((1, H)),
            full((H, HEAD)), full((1, HEAD)),
        ]
        out_specs = (
            pl.BlockSpec((TB, HEAD), lambda i, k: (i, 0)),
            pl.BlockSpec((TB, HEAD), lambda i, k: (i, 0)),
        )
        grid = (nb, nv)
        scratch_shapes = [pltpu.VMEM((TB, Ep), jnp.float32)]
        kernel = embed_model_kernel_streaming
        dim_sem = ("parallel", "arbitrary")

    bow_slab, beo_slab = pl.pallas_call(
        kernel,
        out_shape=out_shape,
        grid_spec=pltpu.PrefetchScalarGridSpec(
            num_scalar_prefetch=0,
            grid=grid,
            in_specs=in_specs,
            out_specs=out_specs,
            scratch_shapes=scratch_shapes,
        ),
        compiler_params=pltpu.CompilerParams(
            dimension_semantics=dim_sem,
            vmem_limit_bytes=vmem_limit,
        ),
    )(counts, x_p, embed_p,
      w_bh, b_bh, w_bhead, b_bhead,
      w_eh, b_eh, w_ehead, b_ehead)

    bow_e = bow_slab[:B, P:P + EM]
    beo_e = beo_slab[:B, P:P + EM]
    bow_p = bow_slab[:B, :P]
    beo_p = beo_slab[:B, :P]
    return bow_e, beo_e, bow_p, beo_p


# ----------------------------- test harness --------------------------------- #

def init_params(key, vocab_size, beo_size, embed_size):
    ks = jax.random.split(key, 13)

    def lin(kw, fan_in, fan_out):
        bound = 1.0 / jnp.sqrt(fan_in)
        w = jax.random.uniform(kw, (fan_in, fan_out), jnp.float32, -bound, bound)
        b = jax.random.uniform(jax.random.fold_in(kw, 1), (1, fan_out),
                               jnp.float32, -bound, bound)
        return w, b

    p = {}
    p["embed"] = jax.random.normal(ks[0], (vocab_size, embed_size), jnp.float32)
    p["w_bow_h"], p["b_bow_h"] = lin(ks[1], embed_size, 256)
    p["w_bow_p"], p["b_bow_p"] = lin(ks[2], 256, 6)
    p["w_bow_e"], p["b_bow_e"] = lin(ks[3], 256, 64)
    p["w_beo_h"], p["b_beo_h"] = lin(ks[4], beo_size, 256)
    p["w_beo_p"], p["b_beo_p"] = lin(ks[5], 256, 6)
    p["w_beo_e"], p["b_beo_e"] = lin(ks[6], 256, 64)
    return p


def reference_forward(sentence, x, params, mean, std):
    xn = (x - mean) / std
    emb = params["embed"][sentence]              # (B, S, E)
    avg = emb.mean(axis=1)                       # (B, E)
    bow_h = jax.nn.leaky_relu(avg @ params["w_bow_h"] + params["b_bow_h"], 0.2)
    beo_h = jax.nn.leaky_relu(xn @ params["w_beo_h"] + params["b_beo_h"], 0.2)
    bow_p = bow_h @ params["w_bow_p"] + params["b_bow_p"]
    beo_p = beo_h @ params["w_beo_p"] + params["b_beo_p"]
    bow_e = bow_h @ params["w_bow_e"] + params["b_bow_e"]
    beo_e = beo_h @ params["w_beo_e"] + params["b_beo_e"]
    return bow_e, beo_e, bow_p, beo_p


if __name__ == "__main__":
    vocab_size, beo_size, embed_size = 32, 16, 32
    B, S = 2, 8
    mean, std = 1.5, 2.0

    key = jax.random.PRNGKey(0)
    k_sent, k_x, k_params = jax.random.split(key, 3)

    sentence = jax.random.randint(k_sent, (B, S), 0, vocab_size, dtype=jnp.int32)
    x = jax.random.normal(k_x, (B, beo_size), jnp.float32) * 2.0 + 1.0
    params = init_params(k_params, vocab_size, beo_size, embed_size)

    outs = embed_model_forward(sentence, x, params, mean, std)
    outs = jax.block_until_ready(outs)

    refs = reference_forward(sentence, x, params, mean, std)
    for o, r in zip(outs, refs):
        assert o.shape == r.shape and o.dtype == r.dtype
        assert jnp.allclose(o, r, atol=2e-4, rtol=2e-4), "mismatch vs reference"

    print("KERNEL_OK")
</pallas_src>

<mosaic_0001>
module attributes {stable_mosaic.version = 11 : i64} {
  func.func @embed_model_kernel_resident(%arg0: i32, %arg1: memref<16x128xbf16, #tpu.memory_space<vmem>>, %arg2: memref<16x128xf32, #tpu.memory_space<vmem>>, %arg3: memref<128x128xf32, #tpu.memory_space<vmem>>, %arg4: memref<128x256xf32, #tpu.memory_space<vmem>>, %arg5: memref<1x256xf32, #tpu.memory_space<vmem>>, %arg6: memref<256x128xf32, #tpu.memory_space<vmem>>, %arg7: memref<1x128xf32, #tpu.memory_space<vmem>>, %arg8: memref<128x256xf32, #tpu.memory_space<vmem>>, %arg9: memref<1x256xf32, #tpu.memory_space<vmem>>, %arg10: memref<256x128xf32, #tpu.memory_space<vmem>>, %arg11: memref<1x128xf32, #tpu.memory_space<vmem>>, %arg12: memref<16x128xf32, #tpu.memory_space<vmem>>, %arg13: memref<16x128xf32, #tpu.memory_space<vmem>>) attributes {dimension_semantics = [#tpu.dimension_semantics<parallel>], iteration_bounds = array<i64: 1>, scalar_prefetch = 0 : i64, scratch_operands = 0 : i64, tpu.core_type = #tpu.core_type<tc>, window_params = [{transform_indices = @transform_0, window_bounds = array<i64: 16, 128>}, {transform_indices = @transform_1, window_bounds = array<i64: 16, 128>}, {pipeline_mode = #tpu.pipeline_mode<synchronous>, transform_indices = @transform_2, window_bounds = array<i64: 128, 128>}, {pipeline_mode = #tpu.pipeline_mode<synchronous>, transform_indices = @transform_3, window_bounds = array<i64: 128, 256>}, {pipeline_mode = #tpu.pipeline_mode<synchronous>, transform_indices = @transform_4, window_bounds = array<i64: 1, 256>}, {pipeline_mode = #tpu.pipeline_mode<synchronous>, transform_indices = @transform_5, window_bounds = array<i64: 256, 128>}, {pipeline_mode = #tpu.pipeline_mode<synchronous>, transform_indices = @transform_6, window_bounds = array<i64: 1, 128>}, {pipeline_mode = #tpu.pipeline_mode<synchronous>, transform_indices = @transform_7, window_bounds = array<i64: 128, 256>}, {pipeline_mode = #tpu.pipeline_mode<synchronous>, transform_indices = @transform_8, window_bounds = array<i64: 1, 256>}, {pipeline_mode = #tpu.pipeline_mode<synchronous>, transform_indices = @transform_9, window_bounds = array<i64: 256, 128>}, {pipeline_mode = #tpu.pipeline_mode<synchronous>, transform_indices = @transform_10, window_bounds = array<i64: 1, 128>}, {transform_indices = @transform_11, window_bounds = array<i64: 16, 128>}, {transform_indices = @transform_12, window_bounds = array<i64: 16, 128>}]} {
    %c0 = arith.constant 0 : index
    %c0_0 = arith.constant 0 : index
    %0 = vector.load %arg1[%c0, %c0_0] : memref<16x128xbf16, #tpu.memory_space<vmem>>, vector<16x128xbf16>
    %1 = arith.extf %0 : vector<16x128xbf16> to vector<16x128xf32>
    %c0_1 = arith.constant 0 : index
    %c0_2 = arith.constant 0 : index
    %2 = vector.load %arg3[%c0_1, %c0_2] : memref<128x128xf32, #tpu.memory_space<vmem>>, vector<128x128xf32>
    %cst = arith.constant dense<0.000000e+00> : vector<16x128xf32>
    %3 = tpu.matmul %1, %2, %cst {dimension_numbers = #tpu.dot_dimension_numbers<[1], [0], [0], [1], [0, 0, 1, 1], [], []>} : vector<16x128xf32>, vector<128x128xf32>, vector<16x128xf32> -> vector<16x128xf32>
    %c0_3 = arith.constant 0 : index
    %c0_4 = arith.constant 0 : index
    %4 = vector.load %arg4[%c0_3, %c0_4] : memref<128x256xf32, #tpu.memory_space<vmem>>, vector<128x256xf32>
    %c0_5 = arith.constant 0 : index
    %c0_6 = arith.constant 0 : index
    %5 = vector.load %arg5[%c0_5, %c0_6] : memref<1x256xf32, #tpu.memory_space<vmem>>, vector<1x256xf32>
    %c0_7 = arith.constant 0 : index
    %c0_8 = arith.constant 0 : index
    %6 = vector.load %arg6[%c0_7, %c0_8] : memref<256x128xf32, #tpu.memory_space<vmem>>, vector<256x128xf32>
    %c0_9 = arith.constant 0 : index
    %c0_10 = arith.constant 0 : index
    %7 = vector.load %arg7[%c0_9, %c0_10] : memref<1x128xf32, #tpu.memory_space<vmem>>, vector<1x128xf32>
    %cst_11 = arith.constant dense<0.000000e+00> : vector<16x256xf32>
    %8 = tpu.matmul %3, %4, %cst_11 {dimension_numbers = #tpu.dot_dimension_numbers<[1], [0], [0], [1], [0, 0, 1, 1], [], []>} : vector<16x128xf32>, vector<128x256xf32>, vector<16x256xf32> -> vector<16x256xf32>
    %9 = vector.broadcast %5 : vector<1x256xf32> to vector<16x256xf32>
    %10 = arith.addf %8, %9 : vector<16x256xf32>
    %cst_12 = arith.constant 0.000000e+00 : f32
    %11 = vector.broadcast %cst_12 : f32 to vector<16x256xf32>
    %12 = arith.cmpf oge, %10, %11 : vector<16x256xf32>
    %cst_13 = arith.constant 2.000000e-01 : f32
    %13 = vector.broadcast %cst_13 : f32 to vector<16x256xf32>
    %14 = arith.mulf %13, %10 : vector<16x256xf32>
    %15 = arith.select %12, %10, %14 : vector<16x256xi1>, vector<16x256xf32>
    %cst_14 = arith.constant dense<0.000000e+00> : vector<16x128xf32>
    %16 = tpu.matmul %15, %6, %cst_14 {dimension_numbers = #tpu.dot_dimension_numbers<[1], [0], [0], [1], [0, 0, 1, 1], [], []>} : vector<16x256xf32>, vector<256x128xf32>, vector<16x128xf32> -> vector<16x128xf32>
    %17 = vector.broadcast %7 : vector<1x128xf32> to vector<16x128xf32>
    %18 = arith.addf %16, %17 : vector<16x128xf32>
    %c0_15 = arith.constant 0 : index
    %c0_16 = arith.constant 0 : index
    %19 = vector.load %arg12[%c0_15, %c0_16] : memref<16x128xf32, #tpu.memory_space<vmem>>, vector<16x128xf32>
    tpu.vector_store %arg12[%c0_15, %c0_16], %18 {strides = array<i32>} : memref<16x128xf32, #tpu.memory_space<vmem>>, vector<16x128xf32>,
    %c0_17 = arith.constant 0 : index
    %c0_18 = arith.constant 0 : index
    %20 = vector.load %arg2[%c0_17, %c0_18] : memref<16x128xf32, #tpu.memory_space<vmem>>, vector<16x128xf32>
    %c0_19 = arith.constant 0 : index
    %c0_20 = arith.constant 0 : index
    %21 = vector.load %arg8[%c0_19, %c0_20] : memref<128x256xf32, #tpu.memory_space<vmem>>, vector<128x256xf32>
    %c0_21 = arith.constant 0 : index
    %c0_22 = arith.constant 0 : index
    %22 = vector.load %arg9[%c0_21, %c0_22] : memref<1x256xf32, #tpu.memory_space<vmem>>, vector<1x256xf32>
    %c0_23 = arith.constant 0 : index
    %c0_24 = arith.constant 0 : index
    %23 = vector.load %arg10[%c0_23, %c0_24] : memref<256x128xf32, #tpu.memory_space<vmem>>, vector<256x128xf32>
    %c0_25 = arith.constant 0 : index
    %c0_26 = arith.constant 0 : index
    %24 = vector.load %arg11[%c0_25, %c0_26] : memref<1x128xf32, #tpu.memory_space<vmem>>, vector<1x128xf32>
    %cst_27 = arith.constant dense<0.000000e+00> : vector<16x256xf32>
    %25 = tpu.matmul %20, %21, %cst_27 {dimension_numbers = #tpu.dot_dimension_numbers<[1], [0], [0], [1], [0, 0, 1, 1], [], []>} : vector<16x128xf32>, vector<128x256xf32>, vector<16x256xf32> -> vector<16x256xf32>
    %26 = vector.broadcast %22 : vector<1x256xf32> to vector<16x256xf32>
    %27 = arith.addf %25, %26 : vector<16x256xf32>
    %cst_28 = arith.constant 0.000000e+00 : f32
    %28 = vector.broadcast %cst_28 : f32 to vector<16x256xf32>
    %29 = arith.cmpf oge, %27, %28 : vector<16x256xf32>
    %cst_29 = arith.constant 2.000000e-01 : f32
    %30 = vector.broadcast %cst_29 : f32 to vector<16x256xf32>
    %31 = arith.mulf %30, %27 : vector<16x256xf32>
    %32 = arith.select %29, %27, %31 : vector<16x256xi1>, vector<16x256xf32>
    %cst_30 = arith.constant dense<0.000000e+00> : vector<16x128xf32>
    %33 = tpu.matmul %32, %23, %cst_30 {dimension_numbers = #tpu.dot_dimension_numbers<[1], [0], [0], [1], [0, 0, 1, 1], [], []>} : vector<16x256xf32>, vector<256x128xf32>, vector<16x128xf32> -> vector<16x128xf32>
    %34 = vector.broadcast %24 : vector<1x128xf32> to vector<16x128xf32>
    %35 = arith.addf %33, %34 : vector<16x128xf32>
    %c0_31 = arith.constant 0 : index
    %c0_32 = arith.constant 0 : index
    %36 = vector.load %arg13[%c0_31, %c0_32] : memref<16x128xf32, #tpu.memory_space<vmem>>, vector<16x128xf32>
    tpu.vector_store %arg13[%c0_31, %c0_32], %35 {strides = array<i32>} : memref<16x128xf32, #tpu.memory_space<vmem>>, vector<16x128xf32>,
    return
  }
  func.func @transform_0(%arg0: i32) -> (i32, i32) {
    %c0_i32 = arith.constant 0 : i32
    %c0_i32_0 = arith.constant 0 : i32
    return %arg0, %c0_i32 : i32, i32
  }
  func.func @transform_1(%arg0: i32) -> (i32, i32) {
    %c0_i32 = arith.constant 0 : i32
    %c0_i32_0 = arith.constant 0 : i32
    return %arg0, %c0_i32 : i32, i32
  }
  func.func @transform_2(%arg0: i32) -> (i32, i32) {
    %c0_i32 = arith.constant 0 : i32
    %c0_i32_0 = arith.constant 0 : i32
    %c0_i32_1 = arith.constant 0 : i32
    return %c0_i32, %c0_i32_0 : i32, i32
  }
  func.func @transform_3(%arg0: i32) -> (i32, i32) {
    %c0_i32 = arith.constant 0 : i32
    %c0_i32_0 = arith.constant 0 : i32
    %c0_i32_1 = arith.constant 0 : i32
    return %c0_i32, %c0_i32_0 : i32, i32
  }
  func.func @transform_4(%arg0: i32) -> (i32, i32) {
    %c0_i32 = arith.constant 0 : i32
    %c0_i32_0 = arith.constant 0 : i32
    %c0_i32_1 = arith.constant 0 : i32
    return %c0_i32, %c0_i32_0 : i32, i32
  }
  func.func @transform_5(%arg0: i32) -> (i32, i32) {
    %c0_i32 = arith.constant 0 : i32
    %c0_i32_0 = arith.constant 0 : i32
    %c0_i32_1 = arith.constant 0 : i32
    return %c0_i32, %c0_i32_0 : i32, i32
  }
  func.func @transform_6(%arg0: i32) -> (i32, i32) {
    %c0_i32 = arith.constant 0 : i32
    %c0_i32_0 = arith.constant 0 : i32
    %c0_i32_1 = arith.constant 0 : i32
    return %c0_i32, %c0_i32_0 : i32, i32
  }
  func.func @transform_7(%arg0: i32) -> (i32, i32) {
    %c0_i32 = arith.constant 0 : i32
    %c0_i32_0 = arith.constant 0 : i32
    %c0_i32_1 = arith.constant 0 : i32
    return %c0_i32, %c0_i32_0 : i32, i32
  }
  func.func @transform_8(%arg0: i32) -> (i32, i32) {
    %c0_i32 = arith.constant 0 : i32
    %c0_i32_0 = arith.constant 0 : i32
    %c0_i32_1 = arith.constant 0 : i32
    return %c0_i32, %c0_i32_0 : i32, i32
  }
  func.func @transform_9(%arg0: i32) -> (i32, i32) {
    %c0_i32 = arith.constant 0 : i32
    %c0_i32_0 = arith.constant 0 : i32
    %c0_i32_1 = arith.constant 0 : i32
    return %c0_i32, %c0_i32_0 : i32, i32
  }
  func.func @transform_10(%arg0: i32) -> (i32, i32) {
    %c0_i32 = arith.constant 0 : i32
    %c0_i32_0 = arith.constant 0 : i32
    %c0_i32_1 = arith.constant 0 : i32
    return %c0_i32, %c0_i32_0 : i32, i32
  }
  func.func @transform_11(%arg0: i32) -> (i32, i32) {
    %c0_i32 = arith.constant 0 : i32
    %c0_i32_0 = arith.constant 0 : i32
    return %arg0, %c0_i32 : i32, i32
  }
  func.func @transform_12(%arg0: i32) -> (i32, i32) {
    %c0_i32 = arith.constant 0 : i32
    %c0_i32_0 = arith.constant 0 : i32
    return %arg0, %c0_i32 : i32, i32
  }
}

</mosaic_0001>

<bundles_post_ra>
// kernel: tpu_custom_call.1
= control target key start
LH: loop header
LB: loop body
LE: loop exit
PB: predicated region body
PF: predicated region fallthrough
CT: control target
= control target key end

     0   :  { %18 = vsyncpa [#allocation3], 0  ;;  %s998_s0 = inlined_call_operand.hbm [shape: bf16[16,128], index: 0, kind: input, shape index: {}]   ;;  %s999_s1 = inlined_call_operand.hbm [shape: f32[16,128], index: 1, kind: input, shape index: {}]   ;;  %s1000_s2 = inlined_call_operand.hbm [shape: f32[128,128], index: 2, kind: input, shape index: {}]   ;;  %s1001_s3 = inlined_call_operand.hbm [shape: f32[128,256], index: 3, kind: input, shape index: {}]   ;;  %s1002_s4 = inlined_call_operand.vmem [shape: f32[1,256], index: 4, kind: input, shape index: {}]   ;;  %s1003_s5 = inlined_call_operand.hbm [shape: f32[256,128], index: 5, kind: input, shape index: {}]   ;;  %s1004_s6 = inlined_call_operand.vmem [shape: f32[1,128], index: 6, kind: input, shape index: {}]   ;;  %s1005_s7 = inlined_call_operand.hbm [shape: f32[128,256], index: 7, kind: input, shape index: {}]   ;;  %s1006_s8 = inlined_call_operand.vmem [shape: f32[1,256], index: 8, kind: input, shape index: {}]   ;;  %s1007_s9 = inlined_call_operand.hbm [shape: f32[256,128], index: 9, kind: input, shape index: {}]   ;;  %s1008_s10 = inlined_call_operand.vmem [shape: f32[1,128], index: 10, kind: input, shape index: {}]   ;;  %s1009_s11 = inlined_call_operand.hbm [shape: f32[16,128], index: 11, kind: output, shape index: {0}]   ;;  %s1010_s12 = inlined_call_operand.hbm [shape: f32[16,128], index: 12, kind: output, shape index: {1}]  }
   0x1   :  { %19 = vsyncpa [#allocation6], 0 }
   0x2   :  { %20 = vsyncpa [#allocation9], 0 }
   0x3   :  { %21 = vsyncpa [#allocation12], 0 }
   0x4   :  { %22 = vsyncpa [#allocation4], 0  ;;  %s41_s23 = sshll.u32 %s999_s1, 4  ;;  %s42_s23 = int_to_ptr.hbm [resolvable:$true] %s41_s23 }
   0x5   :  { %23 = vsyncpa [#allocation16], 0  ;;  %s861_s24 = smov [#allocation5]   ;;  %s67_s28 = sshll.u32 %s1001_s3, 4  ;;  %s68_s28 = int_to_ptr.hbm [resolvable:$true] %s67_s28 }
   0x6   :  { %s43_s25 = sshll.u32 %s861_s24, 4  ;;  %s862_s29 = smov 128   ;;  %s44_s25 = int_to_ptr.vmem [resolvable:$true] %s43_s25 }
   0x7   :  { %s863_s30 = smov 8   ;;  %s864_s13 = smov [#allocation8]  }
   0x8   :  { %49 = dma.hbm_to_vmem [thread:$0]  %s42_s23, 256, %s44_s25, [#allocation6], %s862_s29, %s862_s29, %s863_s30  }
   0x9   :  { %s69_s14 = sshll.u32 %s864_s13, 4  ;;  %s865_s1 = smov 256   ;;  %s70_s14 = int_to_ptr.vmem [resolvable:$true] %s69_s14 }
   0xa   :  { %s866_s15 = smov 16   ;;  %s97_s18 = sshll.u32 %s1005_s7, 4  ;;  %s98_s18 = int_to_ptr.hbm [resolvable:$true] %s97_s18 }
   0xb   :  { %75 = dma.hbm_to_vmem [thread:$0]  %s68_s28, 4096, %s70_s14, [#allocation9], %s865_s1, %s865_s1, %s866_s15  }
   0xc   :  { %s867_s19 = smov [#allocation11]   ;;  %s28_s22 = sshll.u32 %s998_s0, 4  ;;  %s29_s22 = int_to_ptr.hbm [resolvable:$true] %s28_s22 }
   0xd   :  { %s99_s3 = sshll.u32 %s867_s19, 4  ;;  %s868_s23 = smov [#allocation2]   ;;  %s100_s3 = int_to_ptr.vmem [resolvable:$true] %s99_s3 }
   0xe   :  { %105 = dma.hbm_to_vmem [thread:$0]  %s98_s18, 4096, %s100_s3, [#allocation12], %s865_s1, %s865_s1, %s866_s15  }
   0xf   :  { %s30_s24 = sshll.u32 %s868_s23, 4  ;;  %s869_s25 = smov 64   ;;  %s31_s24 = int_to_ptr.vmem [resolvable:$true] %s30_s24 }
  0x10   :  { %s870_s26 = smov 4   ;;  %s54_s7 = sshll.u32 %s1000_s2, 4  ;;  %s55_s7 = int_to_ptr.hbm [resolvable:$true] %s54_s7 }
  0x11   :  { %36 = dma.hbm_to_vmem [thread:$0]  %s29_s22, 128, %s31_s24, [#allocation3], %s869_s25, %s869_s25, %s870_s26  }
  0x12   :  { %s871_s13 = smov [#allocation7]   ;;  %s82_s0 = sshll.u32 %s1003_s5, 4  ;;  %s83_s0 = int_to_ptr.hbm [resolvable:$true] %s82_s0 }
  0x13   :  { %s56_s14 = sshll.u32 %s871_s13, 4  ;;  %s872_s1 = smov [#allocation10]   ;;  %s57_s14 = int_to_ptr.vmem [resolvable:$true] %s56_s14 }
  0x14   :  { %62 = dma.hbm_to_vmem [thread:$0]  %s55_s7, 2048, %s57_s14, [#allocation6], %s862_s29, %s862_s29, %s863_s30  }
  0x15   :  { %s84_s15 = sshll.u32 %s872_s1, 4  ;;  %s112_s3 = sshll.u32 %s1007_s9, 4  ;;  %s85_s15 = int_to_ptr.vmem [resolvable:$true] %s84_s15  ;;  %s113_s3 = int_to_ptr.hbm [resolvable:$true] %s112_s3 }
  0x16   :  { %90 = dma.hbm_to_vmem [thread:$0]  %s83_s0, 4096, %s85_s15, [#allocation9], %s862_s29, %s862_s29, %s863_s30  }
  0x17   :  { %s873_s2 = smov [#allocation13]  }
  0x18   :  { %s114_s20 = sshll.u32 %s873_s2, 4  ;;  %s115_s20 = int_to_ptr.vmem [resolvable:$true] %s114_s20 }
  0x19   :  { %120 = dma.hbm_to_vmem [thread:$0]  %s113_s3, 4096, %s115_s20, [#allocation12], %s862_s29, %s862_s29, %s863_s30  }
  0x1a   :  { %849 = dma.done.wait [#allocation3], 128  }
  0x1b   :  { %850 = vsyncadd [#allocation3], 4294967168 }
  0x1c   :  { %851 = dma.done.wait [#allocation6], 2304  }
  0x1d   :  { %852 = vsyncadd [#allocation6], 4294964992 }
  0x1e   :  { %853 = dma.done.wait [#allocation9], 8192  }
  0x1f   :  { %854 = vsyncadd [#allocation9], 4294959104 }
  0x20   :  { %855 = dma.done.wait [#allocation12], 8192  }
  0x21   :  { %856 = vsyncadd [#allocation12], 4294959104  ;;  %v170_v0 = vld [vmem:[#allocation7 + $0x78] sm:$0xff]  ;;  %v169_v1 = vld [vmem:[#allocation7 + $0x70] sm:$0xff]  ;;  %s874_s23 = smov [#allocation14]   ;;  %s562_s27 = sshll.u32 %s1009_s11, 4  ;;  %s563_s27 = int_to_ptr.hbm [resolvable:$true] %s562_s27 }
  0x22   :  { %171 = vmatpush.msra.mxu0 %v170_v0  ;;  %v168_v2 = vld [vmem:[#allocation7 + $0x68] sm:$0xff]  ;;  %v167_v3 = vld [vmem:[#allocation7 + $0x60] sm:$0xff]  ;;  %v166_v4 = vld [vmem:[#allocation7 + $0x58] sm:$0xff]  ;;  %s560_s24 = sshll.u32 %s874_s23, 4  ;;  %s875_s11 = smov [#allocation15]   ;;  %s561_s24 = int_to_ptr.vmem [resolvable:$true] %s560_s24 }
  0x23   :  { %v165_v5 = vld [vmem:[#allocation7 + $0x50] sm:$0xff]  ;;  %v225_v7 = vld [vmem:[#allocation8 + $0xf8] sm:$0xff]  ;;  %v222_v8 = vld [vmem:[#allocation8 + $0xe0] sm:$0xff]  ;;  %s573_s7 = sshll.u32 %s875_s11, 4  ;;  %s575_s16 = sshll.u32 %s1010_s12, 4  ;;  %s574_s7 = int_to_ptr.vmem [resolvable:$true] %s573_s7  ;;  %s576_s16 = int_to_ptr.hbm [resolvable:$true] %s575_s16 }
  0x24   :  { %172 = vmatpush.msra.mxu0 %v169_v1  ;;  %v224_v6 = vld [vmem:[#allocation8 + $0xf0] sm:$0xff]  ;;  %v223_v9 = vld [vmem:[#allocation8 + $0xe8] sm:$0xff]  ;;  %288 = vmatpush.msra.mxu2 %v225_v7  ;;  %v221_v12 = vld [vmem:[#allocation8 + $0xd8] sm:$0xff] }
  0x25   :  { %265 = vmatpush.msra.mxu1 %v224_v6  ;;  %v164_v10 = vld [vmem:[#allocation7 + $0x48] sm:$0xff]  ;;  %v220_v11 = vld [vmem:[#allocation8 + $0xd0] sm:$0xff]  ;;  %v163_v13 = vld [vmem:[#allocation7 + $0x40] sm:$0xff] }
  0x26   :  { %173 = vmatpush.msra.mxu0 %v168_v2  ;;  %289 = vmatpush.msra.mxu2 %v223_v9  ;;  %v218_v14 = vld [vmem:[#allocation8 + $0xc0] sm:$0xff]  ;;  %v219_v15 = vld [vmem:[#allocation8 + $0xc8] sm:$0xff]  ;;  %v162_v16 = vld [vmem:[#allocation7 + $0x38] sm:$0xff] }
  0x27   :  { %266 = vmatpush.msra.mxu1 %v222_v8  ;;  %v216_v17 = vld [vmem:[#allocation8 + $0xb0] sm:$0xff]  ;;  %v217_v18 = vld [vmem:[#allocation8 + $0xb8] sm:$0xff]  ;;  %v214_v20 = vld [vmem:[#allocation8 + $0xa0] sm:$0xff] }
  0x28   :  { %174 = vmatpush.msra.mxu0 %v167_v3  ;;  %290 = vmatpush.msra.mxu2 %v221_v12  ;;  %v161_v19 = vld [vmem:[#allocation7 + $0x30] sm:$0xff]  ;;  %v215_v21 = vld [vmem:[#allocation8 + $0xa8] sm:$0xff]  ;;  %v213_v24 = vld [vmem:[#allocation8 + $0x98] sm:$0xff] }
  0x29   :  { %267 = vmatpush.msra.mxu1 %v220_v11  ;;  %v160_v22 = vld [vmem:[#allocation7 + $0x28] sm:$0xff]  ;;  %v212_v23 = vld [vmem:[#allocation8 + $0x90] sm:$0xff]  ;;  %v159_v25 = vld [vmem:[#allocation7 + $0x20] sm:$0xff] }
  0x2a   :  { %175 = vmatpush.msra.mxu0 %v166_v4  ;;  %291 = vmatpush.msra.mxu2 %v219_v15  ;;  %v210_v26 = vld [vmem:[#allocation8 + $0x80] sm:$0xff]  ;;  %v211_v27 = vld [vmem:[#allocation8 + $0x88] sm:$0xff]  ;;  %v158_v28 = vld [vmem:[#allocation7 + $0x18] sm:$0xff] }
  0x2b   :  { %268 = vmatpush.msra.mxu1 %v218_v14  ;;  %v208_v29 = vld [vmem:[#allocation8 + $0x70] sm:$0xff]  ;;  %v209_v30 = vld [vmem:[#allocation8 + $0x78] sm:$0xff]  ;;  %v206_v32 = vld [vmem:[#allocation8 + $0x60] sm:$0xff] }
  0x2c   :  { %176 = vmatpush.msra.mxu0 %v165_v5  ;;  %292 = vmatpush.msra.mxu2 %v217_v18  ;;  %v157_v31 = vld [vmem:[#allocation7 + $0x10] sm:$0xff]  ;;  %v597_v33 = vld [vmem:[#allocation2] sm:$0xff]   ;;  %v205_v37 = vld [vmem:[#allocation8 + $0x58] sm:$0xff] }
  0x2d   :  { %269 = vmatpush.msra.mxu1 %v216_v17  ;;  %v207_v34 = vld [vmem:[#allocation8 + $0x68] sm:$0xff]  ;;  %v204_v36 = vld [vmem:[#allocation8 + $0x50] sm:$0xff]  ;;  %v155_v38 = vld [vmem:[#allocation7] sm:$0xff]  ;;  %v598_v39 = vunpack.c.l.bf16 %v597_v33  ;;  %v599_v48 = vunpack.c.h.bf16 %v597_v33 }
  0x2e   :  { %177 = vmatpush.msra.mxu0 %v164_v10  ;;  %293 = vmatpush.msra.mxu2 %v215_v21  ;;  %v156_v35 = vld [vmem:[#allocation7 + $0x8] sm:$0xff]  ;;  %v202_v40 = vld [vmem:[#allocation8 + $0x40] sm:$0xff]  ;;  %v200_v42 = vld [vmem:[#allocation8 + $0x30] sm:$0xff] }
  0x2f   :  { %270 = vmatpush.msra.mxu1 %v214_v20  ;;  %v203_v41 = vld [vmem:[#allocation8 + $0x48] sm:$0xff]  ;;  %v201_v43 = vld [vmem:[#allocation8 + $0x38] sm:$0xff]  ;;  %v198_v44 = vld [vmem:[#allocation8 + $0x20] sm:$0xff] }
  0x30   :  { %178 = vmatpush.msra.mxu0 %v163_v13  ;;  %294 = vmatpush.msra.mxu2 %v213_v24  ;;  %v199_v45 = vld [vmem:[#allocation8 + $0x28] sm:$0xff]  ;;  %v196_v46 = vld [vmem:[#allocation8 + $0x10] sm:$0xff]  ;;  %v197_v47 = vld [vmem:[#allocation8 + $0x18] sm:$0xff] }
  0x31   :  { %271 = vmatpush.msra.mxu1 %v212_v23  ;;  %v194_v49 = vld [vmem:[#allocation8] sm:$0xff]  ;;  %v195_v50 = vld [vmem:[#allocation8 + $0x8] sm:$0xff]  ;;  %v406_v51 = vld [vmem:[#allocation11 + $0xf0] sm:$0xff] }
  0x32   :  { %179 = vmatpush.msra.mxu0 %v162_v16  ;;  %295 = vmatpush.msra.mxu2 %v211_v27  ;;  %v407_v52 = vld [vmem:[#allocation11 + $0xf8] sm:$0xff]  ;;  %v404_v53 = vld [vmem:[#allocation11 + $0xe0] sm:$0xff]  ;;  %v405_v54 = vld [vmem:[#allocation11 + $0xe8] sm:$0xff] }
  0x33   :  { %272 = vmatpush.msra.mxu1 %v210_v26  ;;  %v402_v55 = vld [vmem:[#allocation11 + $0xd0] sm:$0xff]  ;;  %v403_v56 = vld [vmem:[#allocation11 + $0xd8] sm:$0xff]  ;;  %v400_v57 = vld [vmem:[#allocation11 + $0xc0] sm:$0xff] }
  0x34   :  { %180 = vmatpush.msra.mxu0 %v161_v19  ;;  %296 = vmatpush.msra.mxu2 %v209_v30  ;;  %v401_v58 = vld [vmem:[#allocation11 + $0xc8] sm:$0xff]  ;;  %v398_v59 = vld [vmem:[#allocation11 + $0xb0] sm:$0xff]  ;;  %v399_v60 = vld [vmem:[#allocation11 + $0xb8] sm:$0xff] }
  0x35   :  { %273 = vmatpush.msra.mxu1 %v208_v29  ;;  %v396_v61 = vld [vmem:[#allocation11 + $0xa0] sm:$0xff]  ;;  %v397_v62 = vld [vmem:[#allocation11 + $0xa8] sm:$0xff]  ;;  %v394_v63 = vld [vmem:[#allocation11 + $0x90] sm:$0xff] }
  0x36   :  { %181 = vmatpush.msra.mxu0 %v160_v22  ;;  %297 = vmatpush.msra.mxu2 %v207_v34  ;;  %v395_v0 = vld [vmem:[#allocation11 + $0x98] sm:$0xff]  ;;  %v392_v1 = vld [vmem:[#allocation11 + $0x80] sm:$0xff]  ;;  %v393_v2 = vld [vmem:[#allocation11 + $0x88] sm:$0xff] }
  0x37   :  { %274 = vmatpush.msra.mxu1 %v206_v32  ;;  %v390_v3 = vld [vmem:[#allocation11 + $0x70] sm:$0xff]  ;;  %v391_v4 = vld [vmem:[#allocation11 + $0x78] sm:$0xff]  ;;  %v388_v5 = vld [vmem:[#allocation11 + $0x60] sm:$0xff] }
  0x38   :  { %182 = vmatpush.msra.mxu0 %v159_v25  ;;  %298 = vmatpush.msra.mxu2 %v205_v37  ;;  %v389_v6 = vld [vmem:[#allocation11 + $0x68] sm:$0xff]  ;;  %v386_v7 = vld [vmem:[#allocation11 + $0x50] sm:$0xff]  ;;  %v387_v8 = vld [vmem:[#allocation11 + $0x58] sm:$0xff] }
  0x39   :  { %275 = vmatpush.msra.mxu1 %v204_v36  ;;  %v384_v9 = vld [vmem:[#allocation11 + $0x40] sm:$0xff]  ;;  %v385_v10 = vld [vmem:[#allocation11 + $0x48] sm:$0xff]  ;;  %v382_v11 = vld [vmem:[#allocation11 + $0x30] sm:$0xff] }
  0x3a   :  { %183 = vmatpush.msra.mxu0 %v158_v28  ;;  %299 = vmatpush.msra.mxu2 %v203_v41  ;;  %v383_v12 = vld [vmem:[#allocation11 + $0x38] sm:$0xff]  ;;  %v380_v13 = vld [vmem:[#allocation11 + $0x20] sm:$0xff]  ;;  %v381_v14 = vld [vmem:[#allocation11 + $0x28] sm:$0xff] }
  0x3b   :  { %276 = vmatpush.msra.mxu1 %v202_v40  ;;  %v378_v15 = vld [vmem:[#allocation11 + $0x10] sm:$0xff]  ;;  %v379_v16 = vld [vmem:[#allocation11 + $0x18] sm:$0xff]  ;;  %v376_v17 = vld [vmem:[#allocation11] sm:$0xff] }
  0x3c   :  { %184 = vmatpush.msra.mxu0 %v157_v31  ;;  %300 = vmatpush.msra.mxu2 %v201_v43  ;;  %v377_v18 = vld [vmem:[#allocation11 + $0x8] sm:$0xff]  ;;  %v242_v19 = vld [vmem:[#allocation10 + $0x78] sm:$0xff]  ;;  %v241_v20 = vld [vmem:[#allocation10 + $0x70] sm:$0xff] }
  0x3d   :  { %277 = vmatpush.msra.mxu1 %v200_v42  ;;  %326 = vmatpush.msra.mxu3 %v242_v19  ;;  %v258_v21 = vld [vmem:[#allocation10 + $0xf8] sm:$0xff]  ;;  %v240_v22 = vld [vmem:[#allocation10 + $0x68] sm:$0xff]  ;;  %v257_v23 = vld [vmem:[#allocation10 + $0xf0] sm:$0xff] }
  0x3e   :  { %185 = vmatpush.msra.mxu0 %v156_v35  ;;  %301 = vmatpush.msra.mxu2 %v199_v45  ;;  %v256_v24 = vld [vmem:[#allocation10 + $0xe8] sm:$0xff]  ;;  %v239_v25 = vld [vmem:[#allocation10 + $0x60] sm:$0xff]  ;;  %v238_v26 = vld [vmem:[#allocation10 + $0x58] sm:$0xff] }
  0x3f   :  { %278 = vmatpush.msra.mxu1 %v198_v44  ;;  %327 = vmatpush.msra.mxu3 %v241_v20  ;;  %v255_v27 = vld [vmem:[#allocation10 + $0xe0] sm:$0xff]  ;;  %v237_v29 = vld [vmem:[#allocation10 + $0x50] sm:$0xff]  ;;  %v254_v30 = vld [vmem:[#allocation10 + $0xd8] sm:$0xff] }
  0x40   :  { %186 = vmatpush.msra.mxu0 %v155_v38  ;;  %302 = vmatpush.msra.mxu2 %v197_v47  ;;  %v236_v31 = vld [vmem:[#allocation10 + $0x48] sm:$0xff]  ;;  %v253_v32 = vld [vmem:[#allocation10 + $0xd0] sm:$0xff]  ;;  %v235_v33 = vld [vmem:[#allocation10 + $0x40] sm:$0xff] }
  0x41   :  { %187 = vmatmul.f32.vlgmr.msra.gmra.mxu0 %v598_v39  ;;  %279 = vmatpush.msra.mxu1 %v196_v46  ;;  %v252_v34 = vld [vmem:[#allocation10 + $0xc8] sm:$0xff]  ;;  %v440_v35 = vld [vmem:[#allocation13 + $0xf8] sm:$0xff]  ;;  %v251_v37 = vld [vmem:[#allocation10 + $0xc0] sm:$0xff] }
  0x42   :  { %303 = vmatpush.msra.mxu2 %v195_v50  ;;  %349 = vmatpush.msrb.mxu0 %v258_v21  ;;  %v234_v36 = vld [vmem:[#allocation10 + $0x38] sm:$0xff]  ;;  %v233_v39 = vld [vmem:[#allocation10 + $0x30] sm:$0xff]  ;;  %v232_v42 = vld [vmem:[#allocation10 + $0x28] sm:$0xff] }
  0x43   :  { %280 = vmatpush.msra.mxu1 %v194_v49  ;;  %328 = vmatpush.msra.mxu3 %v240_v22  ;;  %v250_v40 = vld [vmem:[#allocation10 + $0xb8] sm:$0xff]  ;;  %v439_v41 = vld [vmem:[#allocation13 + $0xf0] sm:$0xff]  ;;  %v231_v44 = vld [vmem:[#allocation10 + $0x20] sm:$0xff] }
  0x44   :  { %470 = vmatpush.msrb.mxu2 %v407_v52  ;;  %350 = vmatpush.msrb.mxu0 %v257_v23  ;;  %v249_v43 = vld [vmem:[#allocation10 + $0xb0] sm:$0xff]  ;;  %v248_v45 = vld [vmem:[#allocation10 + $0xa8] sm:$0xff]  ;;  %v230_v47 = vld [vmem:[#allocation10 + $0x18] sm:$0xff] }
  0x45   :  { %447 = vmatpush.msrb.mxu1 %v406_v51  ;;  %329 = vmatpush.msra.mxu3 %v239_v25  ;;  %v374_v46 = vld [vmem:[#allocation5] sm:$0xff]  ;;  %v246_v50 = vld [vmem:[#allocation10 + $0x98] sm:$0xff]  ;;  %v228_v51 = vld [vmem:[#allocation10 + $0x8] sm:$0xff] }
  0x46   :  { %471 = vmatpush.msrb.mxu2 %v405_v54  ;;  %351 = vmatpush.msrb.mxu0 %v256_v24  ;;  %v229_v49 = vld [vmem:[#allocation10 + $0x10] sm:$0xff]  ;;  %v244_v54 = vld [vmem:[#allocation10 + $0x88] sm:$0xff]  ;;  %v428_v19 = vld [vmem:[#allocation13 + $0x98] sm:$0xff] }
  0x47   :  { %448 = vmatpush.msrb.mxu1 %v404_v53  ;;  %330 = vmatpush.msra.mxu3 %v238_v26  ;;  %v245_v52 = vld [vmem:[#allocation10 + $0x90] sm:$0xff]  ;;  %v227_v53 = vld [vmem:[#allocation10] sm:$0xff]  ;;  %v426_v21 = vld [vmem:[#allocation13 + $0x88] sm:$0xff] }
  0x48   :  { %472 = vmatpush.msrb.mxu2 %v403_v56  ;;  %352 = vmatpush.msrb.mxu0 %v255_v27  ;;  %v424_v56 = vld [vmem:[#allocation13 + $0x78] sm:$0xff]  ;;  %v427_v20 = vld [vmem:[#allocation13 + $0x90] sm:$0xff]  ;;  %v425_v22 = vld [vmem:[#allocation13 + $0x80] sm:$0xff] }
  0x49   :  { %190 = vmatmul.f32.gmra.mxu0 %v599_v48  ;;  %449 = vmatpush.msrb.mxu1 %v402_v55  ;;  %v247_v48 = vld [vmem:[#allocation10 + $0xa0] sm:$0xff]  ;;  %v375_v55 = vld [vmem:[#allocation5 + $0x8] sm:$0xff]  ;;  %v226_v23 = vld [vmem:[%s1002_s4] sm:$0x3] }
  0x4a   :  { %473 = vmatpush.msrb.mxu2 %v401_v58  ;;  %331 = vmatpush.msra.mxu3 %v237_v29  ;;  %v423_v58 = vld [vmem:[#allocation13 + $0x70] sm:$0xff]  ;;  %v261_v24 = vperm.slane %v226_v23, 0  ;;  %v262_v27 = vperm.slane %v226_v23, 1 }
  0x4b   :  { %450 = vmatpush.msrb.mxu1 %v400_v57  ;;  %353 = vmatpush.msrb.mxu0 %v254_v30  ;;  %v243_v57 = vld [vmem:[#allocation10 + $0x80] sm:$0xff] }
  0x4c   :  { %474 = vmatpush.msrb.mxu2 %v399_v60  ;;  %332 = vmatpush.msra.mxu3 %v236_v31  ;;  %v421_v60 = vld [vmem:[#allocation13 + $0x60] sm:$0xff] }
  0x4d   :  { %451 = vmatpush.msrb.mxu1 %v398_v59  ;;  %354 = vmatpush.msrb.mxu0 %v253_v32  ;;  %v422_v59 = vld [vmem:[#allocation13 + $0x68] sm:$0xff] }
  0x4e   :  { %475 = vmatpush.msrb.mxu2 %v397_v62  ;;  %333 = vmatpush.msra.mxu3 %v235_v33  ;;  %v419_v62 = vld [vmem:[#allocation13 + $0x50] sm:$0xff] }
  0x4f   :  { %452 = vmatpush.msrb.mxu1 %v396_v61  ;;  %355 = vmatpush.msrb.mxu0 %v252_v34  ;;  %v420_v61 = vld [vmem:[#allocation13 + $0x58] sm:$0xff] }
  0x50   :  { %476 = vmatpush.msrb.mxu2 %v395_v0  ;;  %334 = vmatpush.msra.mxu3 %v234_v36  ;;  %v418_v0 = vld [vmem:[#allocation13 + $0x48] sm:$0xff] }
  0x51   :  { %453 = vmatpush.msrb.mxu1 %v394_v63  ;;  %356 = vmatpush.msrb.mxu0 %v251_v37  ;;  %v438_v63 = vld [vmem:[#allocation13 + $0xe8] sm:$0xff] }
  0x52   :  { %477 = vmatpush.msrb.mxu2 %v393_v2  ;;  %335 = vmatpush.msra.mxu3 %v233_v39  ;;  %v417_v2 = vld [vmem:[#allocation13 + $0x40] sm:$0xff] }
  0x53   :  { %454 = vmatpush.msrb.mxu1 %v392_v1  ;;  %357 = vmatpush.msrb.mxu0 %v250_v40  ;;  %v437_v1 = vld [vmem:[#allocation13 + $0xe0] sm:$0xff] }
  0x54   :  { %478 = vmatpush.msrb.mxu2 %v391_v4  ;;  %336 = vmatpush.msra.mxu3 %v232_v42  ;;  %v416_v4 = vld [vmem:[#allocation13 + $0x38] sm:$0xff] }
  0x55   :  { %455 = vmatpush.msrb.mxu1 %v390_v3  ;;  %358 = vmatpush.msrb.mxu0 %v249_v43  ;;  %v436_v3 = vld [vmem:[#allocation13 + $0xd8] sm:$0xff] }
  0x56   :  { %479 = vmatpush.msrb.mxu2 %v389_v6  ;;  %337 = vmatpush.msra.mxu3 %v231_v44  ;;  %v415_v6 = vld [vmem:[#allocation13 + $0x30] sm:$0xff] }
  0x57   :  { %456 = vmatpush.msrb.mxu1 %v388_v5  ;;  %359 = vmatpush.msrb.mxu0 %v248_v45  ;;  %v435_v5 = vld [vmem:[#allocation13 + $0xd0] sm:$0xff] }
  0x58   :  { %480 = vmatpush.msrb.mxu2 %v387_v8  ;;  %338 = vmatpush.msra.mxu3 %v230_v47  ;;  %v414_v8 = vld [vmem:[#allocation13 + $0x28] sm:$0xff] }
  0x59   :  { %457 = vmatpush.msrb.mxu1 %v386_v7  ;;  %360 = vmatpush.msrb.mxu0 %v247_v48  ;;  %v434_v7 = vld [vmem:[#allocation13 + $0xc8] sm:$0xff] }
  0x5a   :  { %481 = vmatpush.msrb.mxu2 %v385_v10  ;;  %339 = vmatpush.msra.mxu3 %v229_v49  ;;  %v413_v10 = vld [vmem:[#allocation13 + $0x20] sm:$0xff] }
  0x5b   :  { %458 = vmatpush.msrb.mxu1 %v384_v9  ;;  %361 = vmatpush.msrb.mxu0 %v246_v50  ;;  %v433_v9 = vld [vmem:[#allocation13 + $0xc0] sm:$0xff] }
  0x5c   :  { %482 = vmatpush.msrb.mxu2 %v383_v12  ;;  %340 = vmatpush.msra.mxu3 %v228_v51  ;;  %v412_v12 = vld [vmem:[#allocation13 + $0x18] sm:$0xff] }
  0x5d   :  { %459 = vmatpush.msrb.mxu1 %v382_v11  ;;  %362 = vmatpush.msrb.mxu0 %v245_v52  ;;  %v432_v11 = vld [vmem:[#allocation13 + $0xb8] sm:$0xff] }
  0x5e   :  { %483 = vmatpush.msrb.mxu2 %v381_v14  ;;  %341 = vmatpush.msra.mxu3 %v227_v53  ;;  %v411_v14 = vld [vmem:[#allocation13 + $0x10] sm:$0xff] }
  0x5f   :  { %460 = vmatpush.msrb.mxu1 %v380_v13  ;;  %363 = vmatpush.msrb.mxu0 %v244_v54  ;;  %v431_v13 = vld [vmem:[#allocation13 + $0xb0] sm:$0xff] }
  0x60   :  { %484 = vmatpush.msrb.mxu2 %v379_v16  ;;  %508 = vmatpush.msrb.mxu3 %v424_v56  ;;  %v410_v16 = vld [vmem:[#allocation13 + $0x8] sm:$0xff] }
  0x61   :  { %461 = vmatpush.msrb.mxu1 %v378_v15  ;;  %364 = vmatpush.msrb.mxu0 %v243_v57  ;;  %v430_v15 = vld [vmem:[#allocation13 + $0xa8] sm:$0xff] }
  0x62   :  { %485 = vmatpush.msrb.mxu2 %v377_v18  ;;  %509 = vmatpush.msrb.mxu3 %v423_v58  ;;  %v409_v18 = vld [vmem:[#allocation13] sm:$0xff] }
  0x63   :  { %462 = vmatpush.msrb.mxu1 %v376_v17  ;;  %531 = vmatpush.msra.mxu0 %v440_v35  ;;  %v429_v17 = vld [vmem:[#allocation13 + $0xa0] sm:$0xff] }
  0x64   :  { %510 = vmatpush.msrb.mxu3 %v422_v59 }
  0x65   :  { %532 = vmatpush.msra.mxu0 %v439_v41 }
  0x66   :  { %511 = vmatpush.msrb.mxu3 %v421_v60 }
  0x67   :  { %533 = vmatpush.msra.mxu0 %v438_v63 }
  0x68   :  { %512 = vmatpush.msrb.mxu3 %v420_v61  ;;  %v631_v61 = vld [vmem:[%s1004_s6] ss:$0 sm:$0xff] }
  0x69   :  { %534 = vmatpush.msra.mxu0 %v437_v1 }
  0x6a   :  { %513 = vmatpush.msrb.mxu3 %v419_v62 }
  0x6b   :  { %535 = vmatpush.msra.mxu0 %v436_v3 }
  0x6c   :  { %514 = vmatpush.msrb.mxu3 %v418_v0 }
  0x6d   :  { %536 = vmatpush.msra.mxu0 %v435_v5 }
  0x6e   :  { %515 = vmatpush.msrb.mxu3 %v417_v2 }
  0x6f   :  { %537 = vmatpush.msra.mxu0 %v434_v7 }
  0x70   :  { %516 = vmatpush.msrb.mxu3 %v416_v4 }
  0x71   :  { %538 = vmatpush.msra.mxu0 %v433_v9 }
  0x72   :  { %517 = vmatpush.msrb.mxu3 %v415_v6  ;;  %v632_v6 = vld [vmem:[%s1008_s10] ss:$0 sm:$0xff] }
  0x73   :  { %539 = vmatpush.msra.mxu0 %v432_v11 }
  0x74   :  { %518 = vmatpush.msrb.mxu3 %v414_v8 }
  0x75   :  { %540 = vmatpush.msra.mxu0 %v431_v13 }
  0x76   :  { %519 = vmatpush.msrb.mxu3 %v413_v10 }
  0x77   :  { %541 = vmatpush.msra.mxu0 %v430_v15 }
  0x78   :  { %520 = vmatpush.msrb.mxu3 %v412_v12 }
  0x79   :  { %542 = vmatpush.msra.mxu0 %v429_v17 }
  0x7a   :  { %521 = vmatpush.msrb.mxu3 %v411_v14 }
  0x7b   :  { %543 = vmatpush.msra.mxu0 %v428_v19 }
  0x7c   :  { %522 = vmatpush.msrb.mxu3 %v410_v16 }
  0x7d   :  { %544 = vmatpush.msra.mxu0 %v427_v20 }
  0x7e   :  { %523 = vmatpush.msrb.mxu3 %v409_v18 }
  0x7f   :  { %545 = vmatpush.msra.mxu0 %v426_v21 }
  0x81   :  { %546 = vmatpush.msra.mxu0 %v425_v22 }
  0xbe   :  { %v188_v28 = vpop.f32.mrf.mxu0 }
  0xbf   :  { %281 = vmatmul.f32.vlgmr.msra.gmra.mxu1 %v188_v28  ;;  %304 = vmatmul.f32.vlgmr.msra.gmra.mxu2 %v188_v28 }
  0xc0   :  { %600 = vmatpush.msra.mxu1 %v440_v35  ;;  %v408_v35 = vld [vmem:[%s1006_s8] sm:$0x3] }
  0xc1   :  { %v443_v39 = vperm.slane %v408_v35, 0  ;;  %v444_v47 = vperm.slane %v408_v35, 1 }
  0xc2   :  { %601 = vmatpush.msra.mxu1 %v439_v41 }
  0xc4   :  { %602 = vmatpush.msra.mxu1 %v438_v63 }
  0xc6   :  { %v191_v38 = vpop.f32.mrf.mxu0  ;;  %603 = vmatpush.msra.mxu1 %v437_v1 }
  0xc7   :  { %284 = vmatmul.f32.gmra.mxu1 %v191_v38  ;;  %307 = vmatmul.f32.gmra.mxu2 %v191_v38 }
  0xc8   :  { %604 = vmatpush.msra.mxu1 %v436_v3 }
  0xca   :  { %605 = vmatpush.msra.mxu1 %v435_v5 }
  0xcc   :  { %606 = vmatpush.msra.mxu1 %v434_v7 }
  0xce   :  { %607 = vmatpush.msra.mxu1 %v433_v9 }
  0xcf   :  { %463 = vmatmul.f32.vlgmr.msrb.gmra.mxu1 %v374_v46  ;;  %486 = vmatmul.f32.vlgmr.msrb.gmra.mxu2 %v374_v46 }
  0xd0   :  { %608 = vmatpush.msra.mxu1 %v432_v11 }
  0xd2   :  { %609 = vmatpush.msra.mxu1 %v431_v13 }
  0xd4   :  { %610 = vmatpush.msra.mxu1 %v430_v15 }
  0xd6   :  { %611 = vmatpush.msra.mxu1 %v429_v17 }
  0xd7   :  { %466 = vmatmul.f32.gmra.mxu1 %v375_v55  ;;  %489 = vmatmul.f32.gmra.mxu2 %v375_v55 }
  0xd8   :  { %612 = vmatpush.msra.mxu1 %v428_v19 }
  0xda   :  { %613 = vmatpush.msra.mxu1 %v427_v20 }
  0xdc   :  { %614 = vmatpush.msra.mxu1 %v426_v21 }
  0xde   :  { %615 = vmatpush.msra.mxu1 %v425_v22 }
 0x13c   :  { %v282_v25 = vpop.f32.mrf.mxu1 }
 0x13d   :  { %v283_v26 = vadd.f32 %v282_v25, %v261_v24 }
 0x13f   :  { %vm311_vm0 = vcmp.ge.f32.partialorder %v283_v26, 0.0  ;;  %v315_v28 = vmul.f32 0.2, %v283_v26 }
 0x141   :  { %v319_v29 = vsel %vm311_vm0, %v283_v26, %v315_v28 }
 0x142   :  { %v305_v30 = vpop.f32.mrf.mxu2  ;;  %342 = vmatmul.f32.vlgmr.msra.gmra.mxu3 %v319_v29 }
 0x143   :  { %v306_v31 = vadd.f32 %v305_v30, %v262_v27 }
 0x144   :  { %v285_v32 = vpop.f32.mrf.mxu1 }
 0x145   :  { %v316_v33 = vmul.f32 0.2, %v306_v31  ;;  %v286_v34 = vadd.f32 %v285_v32, %v261_v24  ;;  %vm312_vm1 = vcmp.ge.f32.partialorder %v306_v31, 0.0 }
 0x147   :  { %v320_v36 = vsel %vm312_vm1, %v306_v31, %v316_v33  ;;  %vm313_vm2 = vcmp.ge.f32.partialorder %v286_v34, 0.0  ;;  %v317_v37 = vmul.f32 0.2, %v286_v34 }
 0x148   :  { %365 = vmatmul.f32.vlgmr.msrb.gmra.mxu0 %v320_v36 }
 0x149   :  { %v321_v38 = vsel %vm313_vm2, %v286_v34, %v317_v37 }
 0x14a   :  { %v308_v40 = vpop.f32.mrf.mxu2  ;;  %345 = vmatmul.f32.gmra.mxu3 %v321_v38 }
 0x14b   :  { %v309_v41 = vadd.f32 %v308_v40, %v262_v27 }
 0x14c   :  { %v464_v42 = vpop.f32.mrf.mxu1 }
 0x14d   :  { %v465_v43 = vadd.f32 %v464_v42, %v443_v39  ;;  %vm314_vm3 = vcmp.ge.f32.partialorder %v309_v41, 0.0  ;;  %v318_v44 = vmul.f32 0.2, %v309_v41 }
 0x14f   :  { %v497_v45 = vmul.f32 0.2, %v465_v43  ;;  %v322_v46 = vsel %vm314_vm3, %v309_v41, %v318_v44  ;;  %vm493_vm4 = vcmp.ge.f32.partialorder %v465_v43, 0.0 }
 0x150   :  { %368 = vmatmul.f32.gmra.mxu0 %v322_v46 }
 0x151   :  { %v501_v48 = vsel %vm493_vm4, %v465_v43, %v497_v45 }
 0x152   :  { %v487_v49 = vpop.f32.mrf.mxu2  ;;  %524 = vmatmul.f32.vlgmr.msrb.gmra.mxu3 %v501_v48 }
 0x153   :  { %v488_v50 = vadd.f32 %v487_v49, %v444_v47 }
 0x154   :  { %v467_v51 = vpop.f32.mrf.mxu1 }
 0x155   :  { %vm494_vm5 = vcmp.ge.f32.partialorder %v488_v50, 0.0  ;;  %v498_v52 = vmul.f32 0.2, %v488_v50  ;;  %v468_v53 = vadd.f32 %v467_v51, %v443_v39 }
 0x157   :  { %v502_v54 = vsel %vm494_vm5, %v488_v50, %v498_v52  ;;  %vm495_vm6 = vcmp.ge.f32.partialorder %v468_v53, 0.0  ;;  %v499_v55 = vmul.f32 0.2, %v468_v53 }
 0x158   :  { %547 = vmatmul.f32.vlgmr.msra.gmra.mxu0 %v502_v54 }
 0x159   :  { %v503_v56 = vsel %vm495_vm6, %v468_v53, %v499_v55 }
 0x15a   :  { %v490_v57 = vpop.f32.mrf.mxu2  ;;  %527 = vmatmul.f32.gmra.mxu3 %v503_v56 }
 0x15b   :  { %v491_v58 = vadd.f32 %v490_v57, %v444_v47 }
 0x15d   :  { %vm496_vm7 = vcmp.ge.f32.partialorder %v491_v58, 0.0  ;;  %v500_v59 = vmul.f32 0.2, %v491_v58 }
 0x15f   :  { %v504_v60 = vsel %vm496_vm7, %v491_v58, %v500_v59 }
 0x160   :  { %550 = vmatmul.f32.vlgmr.msra.gmra.mxu1 %v504_v60 }
 0x1c5   :  { %v343_v62 = vpop.f32.mrf.mxu3  ;;  %v366_v63 = vpop.f32.mrf.mxu0 }
 0x1c6   :  { %v344_v0 = vadd.f32 %v631_v61, %v343_v62 }
 0x1c8   :  { %v367_v1 = vadd.f32 %v366_v63, %v344_v0 }
 0x1ca   :  { %372 = vst [vmem:[#allocation14] sm:$0xff] %v367_v1 }
 0x1cd   :  { %v346_v2 = vpop.f32.mrf.mxu3  ;;  %v369_v3 = vpop.f32.mrf.mxu0 }
 0x1ce   :  { %v347_v4 = vadd.f32 %v631_v61, %v346_v2 }
 0x1d0   :  { %v370_v5 = vadd.f32 %v369_v3, %v347_v4 }
 0x1d2   :  { %373 = vst [vmem:[#allocation14 + $0x8] sm:$0xff] %v370_v5 }
 0x1d3   :  { %568 = dma.vmem_to_hbm [thread:$0]  %s561_s24, 256, %s563_s27, [#allocation4], %s862_s29, %s862_s29, %s863_s30  }
 0x1d5   :  { %v525_v7 = vpop.f32.mrf.mxu3  ;;  %v548_v9 = vpop.f32.mrf.mxu0 }
 0x1d6   :  { %v526_v8 = vadd.f32 %v632_v6, %v525_v7 }
 0x1d8   :  { %v549_v10 = vadd.f32 %v548_v9, %v526_v8 }
 0x1da   :  { %554 = vst [vmem:[#allocation15] sm:$0xff] %v549_v10 }
 0x1dd   :  { %v528_v11 = vpop.f32.mrf.mxu3  ;;  %v551_v13 = vpop.f32.mrf.mxu1 }
 0x1de   :  { %v529_v12 = vadd.f32 %v632_v6, %v528_v11 }
 0x1e0   :  { %v552_v14 = vadd.f32 %v551_v13, %v529_v12 }
 0x1e2   :  { %555 = vst [vmem:[#allocation15 + $0x8] sm:$0xff] %v552_v14 }
 0x1e3   :  { %581 = dma.vmem_to_hbm [thread:$0]  %s574_s7, 256, %s576_s16, [#allocation16], %s862_s29, %s862_s29, %s863_s30  }
 0x1e4   :  { %857 = dma.done.wait [#allocation4], 256  }
 0x1e5   :  { %858 = vsyncadd [#allocation4], 4294967040 }
 0x1e6   :  { %859 = dma.done.wait [#allocation16], 256  }
 0x1e7   :  { %860 = vsyncadd [#allocation16], 4294967040 }
 0x1e8   :  { %590 = vsyncpa [#allocation3], 1 }
 0x1e9   :  { %591 = vsyncpa [#allocation6], 1 }
 0x1ea   :  { %592 = vsyncpa [#allocation9], 1 }
 0x1eb   :  { %593 = vsyncpa [#allocation12], 1 }
 0x1ec   :  { %594 = vsyncpa [#allocation4], 1 }
 0x1ed   :  { %595 = vsyncpa [#allocation16], 1 }

</bundles_post_ra>
